<compile_context>
chip_gen: v5e
topology: v5e:2x2
jax: 0.10.0
libtpu: 0.0.40
codegen_flags: <defaults>
</compile_context>

<pallas_src>
import functools

import jax
import jax.numpy as jnp
from jax.experimental import pallas as pl
from jax.experimental.pallas import tpu as pltpu

hidden_size = 2
input_size = 4
num_classes = 50
num_layers = 1  # single layer -> dropout=0.2 in nn.LSTM is a no-op (PyTorch only warns)

_LANES = 128          # lane width / padded class dim (unmasked stores)
_SUBLANE = 8          # f32 sublane tile

# ---- packed weight slab row layout (all blocks 8-row aligned) -----------------
_ROW_WIH = 0          # rows [0, 8)    : w_ih^T  (input_size rows used), lanes [0, 4H)
_ROW_WHH = 8          # rows [8, 16)   : w_hh^T  (hidden_size rows used), lanes [0, 4H)
_ROW_B   = 16         # rows [16, 24)  : b_ih + b_hh (1 row used), lanes [0, 4H)
_ROW_W1  = 24         # rows [24, 32)  : fc1 weight^T (hidden_size rows used), 128 lanes
_ROW_B1  = 32         # rows [32, 40)  : fc1 bias (1 row used)
_ROW_W2  = 40         # rows [40, 168) : fc2 weight^T (128 rows), classes in lanes [0, 50)
_ROW_B2  = 168        # rows [168,176) : fc2 bias (1 row used)
_SLAB_ROWS = 176      # 176 x 128 x 4B = 88 KiB resident in VMEM


def lstm_mlp_kernel(x_ref, w_ref, out_ref, *, seq_len, batch_pad, hidden, inp):
    # x_ref:   (T*BP, D) time-major, batch padded to BP rows per step
    #          (row t*BP + b == x[b, t, :], rows b >= B are zero)
    # w_ref:   (176, 128) packed weight slab, layout documented above;
    #          gate column order (i, f, o, g); g columns pre-scaled by 2
    # out_ref: (BP, 128)
    T, BP, H, D = seq_len, batch_pad, hidden, inp
    G = 4 * H
    NROWS = T * BP

    # ---- loop-invariant weight rows, broadcast ONCE (no broadcast_in_dim CSE) ----
    w_hh_b = [jnp.broadcast_to(w_ref[_ROW_WHH + k:_ROW_WHH + k + 1, 0:G], (BP, G))
              for k in range(H)]
    w1_b = [jnp.broadcast_to(w_ref[_ROW_W1 + k:_ROW_W1 + k + 1, :], (BP, _LANES))
            for k in range(H)]
    b1_b = jnp.broadcast_to(w_ref[_ROW_B1:_ROW_B1 + 1, :], (BP, _LANES))
    b2_b = jnp.broadcast_to(w_ref[_ROW_B2:_ROW_B2 + 1, :], (BP, _LANES))

    # ---- hoisted input projection for ALL timesteps: D VPU broadcast-MACs -------
    # (K=D=4, N=4H=8: far too small for the MXU to pay for its push/pop round trip)
    x = x_ref[...]                                               # (T*BP, D)
    gates_x = jnp.broadcast_to(w_ref[_ROW_B:_ROW_B + 1, 0:G], (NROWS, G))
    for k in range(D):
        w_row = jnp.broadcast_to(w_ref[_ROW_WIH + k:_ROW_WIH + k + 1, 0:G],
                                 (NROWS, G))
        gates_x = gates_x + x[:, k:k + 1] * w_row                # (T*BP, 4H)

    h = jnp.zeros((BP, H), jnp.float32)
    c = jnp.zeros((BP, H), jnp.float32)

    # ---- statically unrolled recurrence (T small & static) ----------------------
    for t in range(T):
        gates = gates_x[t * BP:(t + 1) * BP, :]                  # aligned (BP, 4H) tile
        for k in range(H):                                       # VPU MACs, no MXU
            gates = gates + h[:, k:k + 1] * w_hh_b[k]
        sig = jax.nn.sigmoid(gates)                              # ONE EUP pass: i,f,o,g'
        i = sig[:, 0 * H:1 * H]
        f = sig[:, 1 * H:2 * H]
        o = sig[:, 2 * H:3 * H]
        g = 2.0 * sig[:, 3 * H:4 * H] - 1.0                      # tanh(z) = 2*sigmoid(2z)-1
        c = f * c + i * g
        h = o * jnp.tanh(c)

    # hn.view(-1, hidden_size) with num_layers=1 == last-step hidden state (BP, H)
    hn = jnp.maximum(h, 0.0)                                     # ReLU

    # ---- fc1 (contraction K=H=2) as VPU broadcast-MACs --------------------------
    acc1 = b1_b
    for k in range(H):
        acc1 = acc1 + hn[:, k:k + 1] * w1_b[k]
    out1 = jnp.maximum(acc1, 0.0)                                # (BP, 128), ReLU

    # ---- fc2 (K=128) is a legitimate MXU shape -----------------------------------
    out2 = jnp.dot(out1, w_ref[_ROW_W2:_ROW_W2 + _LANES, :],
                   preferred_element_type=jnp.float32) + b2_b    # (BP, 128)
    out_ref[...] = out2.astype(out_ref.dtype)


def init_params(key):
    ks = jax.random.split(key, 8)
    H, D, C = hidden_size, input_size, num_classes
    # nn.LSTM init: U(-1/sqrt(H), 1/sqrt(H)) for all weights & biases
    s = 1.0 / jnp.sqrt(jnp.float32(H))
    w_ih = jax.random.uniform(ks[0], (4 * H, D), jnp.float32, -s, s)   # gates (i,f,g,o)
    w_hh = jax.random.uniform(ks[1], (4 * H, H), jnp.float32, -s, s)
    b_ih = jax.random.uniform(ks[2], (4 * H,), jnp.float32, -s, s)
    b_hh = jax.random.uniform(ks[3], (4 * H,), jnp.float32, -s, s)
    # fc_1: Linear(H, 128); fc_2: Linear(128, C)  (U(-1/sqrt(fan_in), ...))
    s1 = 1.0 / jnp.sqrt(jnp.float32(H))
    w1 = jax.random.uniform(ks[4], (128, H), jnp.float32, -s1, s1)
    b1 = jax.random.uniform(ks[5], (128,), jnp.float32, -s1, s1)
    s2 = 1.0 / jnp.sqrt(jnp.float32(128))
    w2 = jax.random.uniform(ks[6], (C, 128), jnp.float32, -s2, s2)
    b2 = jax.random.uniform(ks[7], (C,), jnp.float32, -s2, s2)
    return dict(w_ih=w_ih, w_hh=w_hh, b_ih=b_ih, b_hh=b_hh,
                w1=w1, b1=b1, w2=w2, b2=b2)


def pack_params(params):
    """One-time weight packing (done at init, NOT per forward call)."""
    H, D, C = hidden_size, input_size, num_classes
    G = 4 * H

    # PyTorch gate order (i, f, g, o) -> (i, f, o, g): sigmoid gates contiguous.
    def reorder(w):
        return jnp.concatenate(
            [w[0:H], w[H:2 * H], w[3 * H:4 * H], w[2 * H:3 * H]], axis=0)

    # Pre-scale the g-gate columns by 2 so tanh(z) == 2*sigmoid(2z) - 1 in-kernel.
    gate_scale = jnp.concatenate(
        [jnp.ones((3 * H,), jnp.float32), jnp.full((H,), 2.0, jnp.float32)])

    w_ih_t = jnp.transpose(reorder(params["w_ih"])) * gate_scale[None, :]   # (D, 4H)
    w_hh_t = jnp.transpose(reorder(params["w_hh"])) * gate_scale[None, :]   # (H, 4H)
    b = reorder(params["b_ih"] + params["b_hh"]) * gate_scale               # (4H,)
    w1_t = jnp.transpose(params["w1"])                                      # (H, 128)
    w2_t = jnp.transpose(params["w2"])                                      # (128, C)

    slab = jnp.zeros((_SLAB_ROWS, _LANES), jnp.float32)
    slab = slab.at[_ROW_WIH:_ROW_WIH + D, 0:G].set(w_ih_t)
    slab = slab.at[_ROW_WHH:_ROW_WHH + H, 0:G].set(w_hh_t)
    slab = slab.at[_ROW_B, 0:G].set(b)
    slab = slab.at[_ROW_W1:_ROW_W1 + H, :].set(w1_t)
    slab = slab.at[_ROW_B1, :].set(params["b1"])
    slab = slab.at[_ROW_W2:_ROW_W2 + _LANES, 0:C].set(w2_t)
    slab = slab.at[_ROW_B2, 0:C].set(params["b2"])
    return slab


def lstm_forward(x, packed):
    # x: (B, T, D) float32, batch_first like the PyTorch module
    # packed: (176, 128) weight slab from pack_params()
    B, T, D = x.shape
    BP = max(_SUBLANE, ((B + _SUBLANE - 1) // _SUBLANE) * _SUBLANE)

    # Pad batch to a full sublane tile, go time-major, flatten so row t*BP + b == x[b, t, :]
    x_pad = jnp.pad(x, ((0, BP - B), (0, 0), (0, 0)))
    x_flat = jnp.transpose(x_pad, (1, 0, 2)).reshape(T * BP, D)

    vmem = pl.BlockSpec(memory_space=pltpu.MemorySpace.VMEM)
    kernel = functools.partial(lstm_mlp_kernel, seq_len=T, batch_pad=BP,
                               hidden=hidden_size, inp=D)
    out_padded = pl.pallas_call(
        kernel,
        out_shape=jax.ShapeDtypeStruct((BP, _LANES), jnp.float32),
        in_specs=[vmem, vmem],
        out_specs=vmem,
        # TODO(synk): if batch ever grows, add a leading batch grid axis with
        # dimension_semantics=("parallel",) so v7x's two TensorCores split it
        # (and the same grid buys DMA/compute pipelining on v5e/v6e).
    )(x_flat, packed)
    return out_padded[:B, :num_classes]


if __name__ == "__main__":
    key = jax.random.PRNGKey(0)
    k_param, k_x = jax.random.split(key)
    params = init_params(k_param)
    packed = jax.block_until_ready(pack_params(params))   # one-time weight prep

    batch, seq = 2, 8
    x = jax.random.normal(k_x, (batch, seq, input_size), jnp.float32)

    forward = jax.jit(lstm_forward)
    out = forward(x, packed)
    jax.block_until_ready(out)
    assert out.shape == (batch, num_classes), out.shape
    print("KERNEL_OK")
</pallas_src>

<mosaic_0001>
module attributes {stable_mosaic.version = 11 : i64} {
  func.func @lstm_mlp_kernel(%arg0: memref<64x4xf32, #tpu.memory_space<vmem>>, %arg1: memref<176x128xf32, #tpu.memory_space<vmem>>, %arg2: memref<8x128xf32, #tpu.memory_space<vmem>>) attributes {dimension_semantics = [], scalar_prefetch = 0 : i64, scratch_operands = 0 : i64, tpu.core_type = #tpu.core_type<tc>} {
    %c8 = arith.constant 8 : index
    %c0 = arith.constant 0 : index
    %0 = vector.load %arg1[%c8, %c0] : memref<176x128xf32, #tpu.memory_space<vmem>>, vector<1x8xf32>
    %1 = vector.shape_cast %0 : vector<1x8xf32> to vector<1x8xf32>
    %2 = vector.broadcast %1 : vector<1x8xf32> to vector<8x8xf32>
    %c9 = arith.constant 9 : index
    %c0_0 = arith.constant 0 : index
    %3 = vector.load %arg1[%c9, %c0_0] : memref<176x128xf32, #tpu.memory_space<vmem>>, vector<1x8xf32>
    %4 = vector.shape_cast %3 : vector<1x8xf32> to vector<1x8xf32>
    %5 = vector.broadcast %4 : vector<1x8xf32> to vector<8x8xf32>
    %c24 = arith.constant 24 : index
    %c0_1 = arith.constant 0 : index
    %6 = vector.load %arg1[%c24, %c0_1] : memref<176x128xf32, #tpu.memory_space<vmem>>, vector<1x128xf32>
    %7 = vector.shape_cast %6 : vector<1x128xf32> to vector<1x128xf32>
    %8 = vector.broadcast %7 : vector<1x128xf32> to vector<8x128xf32>
    %c25 = arith.constant 25 : index
    %c0_2 = arith.constant 0 : index
    %9 = vector.load %arg1[%c25, %c0_2] : memref<176x128xf32, #tpu.memory_space<vmem>>, vector<1x128xf32>
    %10 = vector.shape_cast %9 : vector<1x128xf32> to vector<1x128xf32>
    %11 = vector.broadcast %10 : vector<1x128xf32> to vector<8x128xf32>
    %c32 = arith.constant 32 : index
    %c0_3 = arith.constant 0 : index
    %12 = vector.load %arg1[%c32, %c0_3] : memref<176x128xf32, #tpu.memory_space<vmem>>, vector<1x128xf32>
    %13 = vector.shape_cast %12 : vector<1x128xf32> to vector<1x128xf32>
    %14 = vector.broadcast %13 : vector<1x128xf32> to vector<8x128xf32>
    %c168 = arith.constant 168 : index
    %c0_4 = arith.constant 0 : index
    %15 = vector.load %arg1[%c168, %c0_4] : memref<176x128xf32, #tpu.memory_space<vmem>>, vector<1x128xf32>
    %16 = vector.shape_cast %15 : vector<1x128xf32> to vector<1x128xf32>
    %17 = vector.broadcast %16 : vector<1x128xf32> to vector<8x128xf32>
    %c0_5 = arith.constant 0 : index
    %c0_6 = arith.constant 0 : index
    %18 = vector.load %arg0[%c0_5, %c0_6] : memref<64x4xf32, #tpu.memory_space<vmem>>, vector<64x4xf32>
    %c16 = arith.constant 16 : index
    %c0_7 = arith.constant 0 : index
    %19 = vector.load %arg1[%c16, %c0_7] : memref<176x128xf32, #tpu.memory_space<vmem>>, vector<1x8xf32>
    %20 = vector.shape_cast %19 : vector<1x8xf32> to vector<1x8xf32>
    %21 = vector.broadcast %20 : vector<1x8xf32> to vector<64x8xf32>
    %c0_8 = arith.constant 0 : index
    %c0_9 = arith.constant 0 : index
    %22 = vector.load %arg1[%c0_8, %c0_9] : memref<176x128xf32, #tpu.memory_space<vmem>>, vector<1x8xf32>
    %23 = vector.shape_cast %22 : vector<1x8xf32> to vector<1x8xf32>
    %24 = vector.broadcast %23 : vector<1x8xf32> to vector<64x8xf32>
    %25 = vector.extract_strided_slice %18 {offsets = [0, 0], sizes = [64, 1], strides = [1, 1]} : vector<64x4xf32> to vector<64x1xf32>
    %26 = vector.broadcast %25 : vector<64x1xf32> to vector<64x8xf32>
    %27 = arith.mulf %26, %24 : vector<64x8xf32>
    %28 = arith.addf %21, %27 : vector<64x8xf32>
    %c1 = arith.constant 1 : index
    %c0_10 = arith.constant 0 : index
    %29 = vector.load %arg1[%c1, %c0_10] : memref<176x128xf32, #tpu.memory_space<vmem>>, vector<1x8xf32>
    %30 = vector.shape_cast %29 : vector<1x8xf32> to vector<1x8xf32>
    %31 = vector.broadcast %30 : vector<1x8xf32> to vector<64x8xf32>
    %32 = vector.extract_strided_slice %18 {offsets = [0, 1], sizes = [64, 1], strides = [1, 1]} : vector<64x4xf32> to vector<64x1xf32>
    %33 = vector.broadcast %32 : vector<64x1xf32> to vector<64x8xf32>
    %34 = arith.mulf %33, %31 : vector<64x8xf32>
    %35 = arith.addf %28, %34 : vector<64x8xf32>
    %c2 = arith.constant 2 : index
    %c0_11 = arith.constant 0 : index
    %36 = vector.load %arg1[%c2, %c0_11] : memref<176x128xf32, #tpu.memory_space<vmem>>, vector<1x8xf32>
    %37 = vector.shape_cast %36 : vector<1x8xf32> to vector<1x8xf32>
    %38 = vector.broadcast %37 : vector<1x8xf32> to vector<64x8xf32>
    %39 = vector.extract_strided_slice %18 {offsets = [0, 2], sizes = [64, 1], strides = [1, 1]} : vector<64x4xf32> to vector<64x1xf32>
    %40 = vector.broadcast %39 : vector<64x1xf32> to vector<64x8xf32>
    %41 = arith.mulf %40, %38 : vector<64x8xf32>
    %42 = arith.addf %35, %41 : vector<64x8xf32>
    %c3 = arith.constant 3 : index
    %c0_12 = arith.constant 0 : index
    %43 = vector.load %arg1[%c3, %c0_12] : memref<176x128xf32, #tpu.memory_space<vmem>>, vector<1x8xf32>
    %44 = vector.shape_cast %43 : vector<1x8xf32> to vector<1x8xf32>
    %45 = vector.broadcast %44 : vector<1x8xf32> to vector<64x8xf32>
    %46 = vector.extract_strided_slice %18 {offsets = [0, 3], sizes = [64, 1], strides = [1, 1]} : vector<64x4xf32> to vector<64x1xf32>
    %47 = vector.broadcast %46 : vector<64x1xf32> to vector<64x8xf32>
    %48 = arith.mulf %47, %45 : vector<64x8xf32>
    %49 = arith.addf %42, %48 : vector<64x8xf32>
    %cst = arith.constant 0.000000e+00 : f32
    %50 = vector.broadcast %cst : f32 to vector<8x2xf32>
    %cst_13 = arith.constant 0.000000e+00 : f32
    %51 = vector.broadcast %cst_13 : f32 to vector<8x2xf32>
    %52 = vector.extract_strided_slice %49 {offsets = [0, 0], sizes = [8, 8], strides = [1, 1]} : vector<64x8xf32> to vector<8x8xf32>
    %53 = vector.extract_strided_slice %50 {offsets = [0, 0], sizes = [8, 1], strides = [1, 1]} : vector<8x2xf32> to vector<8x1xf32>
    %54 = vector.broadcast %53 : vector<8x1xf32> to vector<8x8xf32>
    %55 = arith.mulf %54, %2 : vector<8x8xf32>
    %56 = arith.addf %52, %55 : vector<8x8xf32>
    %57 = vector.extract_strided_slice %50 {offsets = [0, 1], sizes = [8, 1], strides = [1, 1]} : vector<8x2xf32> to vector<8x1xf32>
    %58 = vector.broadcast %57 : vector<8x1xf32> to vector<8x8xf32>
    %59 = arith.mulf %58, %5 : vector<8x8xf32>
    %60 = arith.addf %56, %59 : vector<8x8xf32>
    %61 = arith.negf %60 : vector<8x8xf32>
    %62 = math.exp %61 : vector<8x8xf32>
    %cst_14 = arith.constant 1.000000e+00 : f32
    %63 = vector.broadcast %cst_14 : f32 to vector<8x8xf32>
    %64 = arith.addf %63, %62 : vector<8x8xf32>
    %65 = arith.divf %63, %64 : vector<8x8xf32>
    %66 = vector.extract_strided_slice %65 {offsets = [0, 0], sizes = [8, 2], strides = [1, 1]} : vector<8x8xf32> to vector<8x2xf32>
    %67 = vector.extract_strided_slice %65 {offsets = [0, 2], sizes = [8, 2], strides = [1, 1]} : vector<8x8xf32> to vector<8x2xf32>
    %68 = vector.extract_strided_slice %65 {offsets = [0, 4], sizes = [8, 2], strides = [1, 1]} : vector<8x8xf32> to vector<8x2xf32>
    %69 = vector.extract_strided_slice %65 {offsets = [0, 6], sizes = [8, 2], strides = [1, 1]} : vector<8x8xf32> to vector<8x2xf32>
    %cst_15 = arith.constant 2.000000e+00 : f32
    %70 = vector.broadcast %cst_15 : f32 to vector<8x2xf32>
    %71 = arith.mulf %70, %69 : vector<8x2xf32>
    %cst_16 = arith.constant 1.000000e+00 : f32
    %72 = vector.broadcast %cst_16 : f32 to vector<8x2xf32>
    %73 = arith.subf %71, %72 : vector<8x2xf32>
    %74 = arith.mulf %67, %51 : vector<8x2xf32>
    %75 = arith.mulf %66, %73 : vector<8x2xf32>
    %76 = arith.addf %74, %75 : vector<8x2xf32>
    %77 = math.tanh %76 : vector<8x2xf32>
    %78 = arith.mulf %68, %77 : vector<8x2xf32>
    %79 = vector.extract_strided_slice %49 {offsets = [8, 0], sizes = [8, 8], strides = [1, 1]} : vector<64x8xf32> to vector<8x8xf32>
    %80 = vector.extract_strided_slice %78 {offsets = [0, 0], sizes = [8, 1], strides = [1, 1]} : vector<8x2xf32> to vector<8x1xf32>
    %81 = vector.broadcast %80 : vector<8x1xf32> to vector<8x8xf32>
    %82 = arith.mulf %81, %2 : vector<8x8xf32>
    %83 = arith.addf %79, %82 : vector<8x8xf32>
    %84 = vector.extract_strided_slice %78 {offsets = [0, 1], sizes = [8, 1], strides = [1, 1]} : vector<8x2xf32> to vector<8x1xf32>
    %85 = vector.broadcast %84 : vector<8x1xf32> to vector<8x8xf32>
    %86 = arith.mulf %85, %5 : vector<8x8xf32>
    %87 = arith.addf %83, %86 : vector<8x8xf32>
    %88 = arith.negf %87 : vector<8x8xf32>
    %89 = math.exp %88 : vector<8x8xf32>
    %cst_17 = arith.constant 1.000000e+00 : f32
    %90 = vector.broadcast %cst_17 : f32 to vector<8x8xf32>
    %91 = arith.addf %90, %89 : vector<8x8xf32>
    %92 = arith.divf %90, %91 : vector<8x8xf32>
    %93 = vector.extract_strided_slice %92 {offsets = [0, 0], sizes = [8, 2], strides = [1, 1]} : vector<8x8xf32> to vector<8x2xf32>
    %94 = vector.extract_strided_slice %92 {offsets = [0, 2], sizes = [8, 2], strides = [1, 1]} : vector<8x8xf32> to vector<8x2xf32>
    %95 = vector.extract_strided_slice %92 {offsets = [0, 4], sizes = [8, 2], strides = [1, 1]} : vector<8x8xf32> to vector<8x2xf32>
    %96 = vector.extract_strided_slice %92 {offsets = [0, 6], sizes = [8, 2], strides = [1, 1]} : vector<8x8xf32> to vector<8x2xf32>
    %cst_18 = arith.constant 2.000000e+00 : f32
    %97 = vector.broadcast %cst_18 : f32 to vector<8x2xf32>
    %98 = arith.mulf %97, %96 : vector<8x2xf32>
    %cst_19 = arith.constant 1.000000e+00 : f32
    %99 = vector.broadcast %cst_19 : f32 to vector<8x2xf32>
    %100 = arith.subf %98, %99 : vector<8x2xf32>
    %101 = arith.mulf %94, %76 : vector<8x2xf32>
    %102 = arith.mulf %93, %100 : vector<8x2xf32>
    %103 = arith.addf %101, %102 : vector<8x2xf32>
    %104 = math.tanh %103 : vector<8x2xf32>
    %105 = arith.mulf %95, %104 : vector<8x2xf32>
    %106 = vector.extract_strided_slice %49 {offsets = [16, 0], sizes = [8, 8], strides = [1, 1]} : vector<64x8xf32> to vector<8x8xf32>
    %107 = vector.extract_strided_slice %105 {offsets = [0, 0], sizes = [8, 1], strides = [1, 1]} : vector<8x2xf32> to vector<8x1xf32>
    %108 = vector.broadcast %107 : vector<8x1xf32> to vector<8x8xf32>
    %109 = arith.mulf %108, %2 : vector<8x8xf32>
    %110 = arith.addf %106, %109 : vector<8x8xf32>
    %111 = vector.extract_strided_slice %105 {offsets = [0, 1], sizes = [8, 1], strides = [1, 1]} : vector<8x2xf32> to vector<8x1xf32>
    %112 = vector.broadcast %111 : vector<8x1xf32> to vector<8x8xf32>
    %113 = arith.mulf %112, %5 : vector<8x8xf32>
    %114 = arith.addf %110, %113 : vector<8x8xf32>
    %115 = arith.negf %114 : vector<8x8xf32>
    %116 = math.exp %115 : vector<8x8xf32>
    %cst_20 = arith.constant 1.000000e+00 : f32
    %117 = vector.broadcast %cst_20 : f32 to vector<8x8xf32>
    %118 = arith.addf %117, %116 : vector<8x8xf32>
    %119 = arith.divf %117, %118 : vector<8x8xf32>
    %120 = vector.extract_strided_slice %119 {offsets = [0, 0], sizes = [8, 2], strides = [1, 1]} : vector<8x8xf32> to vector<8x2xf32>
    %121 = vector.extract_strided_slice %119 {offsets = [0, 2], sizes = [8, 2], strides = [1, 1]} : vector<8x8xf32> to vector<8x2xf32>
    %122 = vector.extract_strided_slice %119 {offsets = [0, 4], sizes = [8, 2], strides = [1, 1]} : vector<8x8xf32> to vector<8x2xf32>
    %123 = vector.extract_strided_slice %119 {offsets = [0, 6], sizes = [8, 2], strides = [1, 1]} : vector<8x8xf32> to vector<8x2xf32>
    %cst_21 = arith.constant 2.000000e+00 : f32
    %124 = vector.broadcast %cst_21 : f32 to vector<8x2xf32>
    %125 = arith.mulf %124, %123 : vector<8x2xf32>
    %cst_22 = arith.constant 1.000000e+00 : f32
    %126 = vector.broadcast %cst_22 : f32 to vector<8x2xf32>
    %127 = arith.subf %125, %126 : vector<8x2xf32>
    %128 = arith.mulf %121, %103 : vector<8x2xf32>
    %129 = arith.mulf %120, %127 : vector<8x2xf32>
    %130 = arith.addf %128, %129 : vector<8x2xf32>
    %131 = math.tanh %130 : vector<8x2xf32>
    %132 = arith.mulf %122, %131 : vector<8x2xf32>
    %133 = vector.extract_strided_slice %49 {offsets = [24, 0], sizes = [8, 8], strides = [1, 1]} : vector<64x8xf32> to vector<8x8xf32>
    %134 = vector.extract_strided_slice %132 {offsets = [0, 0], sizes = [8, 1], strides = [1, 1]} : vector<8x2xf32> to vector<8x1xf32>
    %135 = vector.broadcast %134 : vector<8x1xf32> to vector<8x8xf32>
    %136 = arith.mulf %135, %2 : vector<8x8xf32>
    %137 = arith.addf %133, %136 : vector<8x8xf32>
    %138 = vector.extract_strided_slice %132 {offsets = [0, 1], sizes = [8, 1], strides = [1, 1]} : vector<8x2xf32> to vector<8x1xf32>
    %139 = vector.broadcast %138 : vector<8x1xf32> to vector<8x8xf32>
    %140 = arith.mulf %139, %5 : vector<8x8xf32>
    %141 = arith.addf %137, %140 : vector<8x8xf32>
    %142 = arith.negf %141 : vector<8x8xf32>
    %143 = math.exp %142 : vector<8x8xf32>
    %cst_23 = arith.constant 1.000000e+00 : f32
    %144 = vector.broadcast %cst_23 : f32 to vector<8x8xf32>
    %145 = arith.addf %144, %143 : vector<8x8xf32>
    %146 = arith.divf %144, %145 : vector<8x8xf32>
    %147 = vector.extract_strided_slice %146 {offsets = [0, 0], sizes = [8, 2], strides = [1, 1]} : vector<8x8xf32> to vector<8x2xf32>
    %148 = vector.extract_strided_slice %146 {offsets = [0, 2], sizes = [8, 2], strides = [1, 1]} : vector<8x8xf32> to vector<8x2xf32>
    %149 = vector.extract_strided_slice %146 {offsets = [0, 4], sizes = [8, 2], strides = [1, 1]} : vector<8x8xf32> to vector<8x2xf32>
    %150 = vector.extract_strided_slice %146 {offsets = [0, 6], sizes = [8, 2], strides = [1, 1]} : vector<8x8xf32> to vector<8x2xf32>
    %cst_24 = arith.constant 2.000000e+00 : f32
    %151 = vector.broadcast %cst_24 : f32 to vector<8x2xf32>
    %152 = arith.mulf %151, %150 : vector<8x2xf32>
    %cst_25 = arith.constant 1.000000e+00 : f32
    %153 = vector.broadcast %cst_25 : f32 to vector<8x2xf32>
    %154 = arith.subf %152, %153 : vector<8x2xf32>
    %155 = arith.mulf %148, %130 : vector<8x2xf32>
    %156 = arith.mulf %147, %154 : vector<8x2xf32>
    %157 = arith.addf %155, %156 : vector<8x2xf32>
    %158 = math.tanh %157 : vector<8x2xf32>
    %159 = arith.mulf %149, %158 : vector<8x2xf32>
    %160 = vector.extract_strided_slice %49 {offsets = [32, 0], sizes = [8, 8], strides = [1, 1]} : vector<64x8xf32> to vector<8x8xf32>
    %161 = vector.extract_strided_slice %159 {offsets = [0, 0], sizes = [8, 1], strides = [1, 1]} : vector<8x2xf32> to vector<8x1xf32>
    %162 = vector.broadcast %161 : vector<8x1xf32> to vector<8x8xf32>
    %163 = arith.mulf %162, %2 : vector<8x8xf32>
    %164 = arith.addf %160, %163 : vector<8x8xf32>
    %165 = vector.extract_strided_slice %159 {offsets = [0, 1], sizes = [8, 1], strides = [1, 1]} : vector<8x2xf32> to vector<8x1xf32>
    %166 = vector.broadcast %165 : vector<8x1xf32> to vector<8x8xf32>
    %167 = arith.mulf %166, %5 : vector<8x8xf32>
    %168 = arith.addf %164, %167 : vector<8x8xf32>
    %169 = arith.negf %168 : vector<8x8xf32>
    %170 = math.exp %169 : vector<8x8xf32>
    %cst_26 = arith.constant 1.000000e+00 : f32
    %171 = vector.broadcast %cst_26 : f32 to vector<8x8xf32>
    %172 = arith.addf %171, %170 : vector<8x8xf32>
    %173 = arith.divf %171, %172 : vector<8x8xf32>
    %174 = vector.extract_strided_slice %173 {offsets = [0, 0], sizes = [8, 2], strides = [1, 1]} : vector<8x8xf32> to vector<8x2xf32>
    %175 = vector.extract_strided_slice %173 {offsets = [0, 2], sizes = [8, 2], strides = [1, 1]} : vector<8x8xf32> to vector<8x2xf32>
    %176 = vector.extract_strided_slice %173 {offsets = [0, 4], sizes = [8, 2], strides = [1, 1]} : vector<8x8xf32> to vector<8x2xf32>
    %177 = vector.extract_strided_slice %173 {offsets = [0, 6], sizes = [8, 2], strides = [1, 1]} : vector<8x8xf32> to vector<8x2xf32>
    %cst_27 = arith.constant 2.000000e+00 : f32
    %178 = vector.broadcast %cst_27 : f32 to vector<8x2xf32>
    %179 = arith.mulf %178, %177 : vector<8x2xf32>
    %cst_28 = arith.constant 1.000000e+00 : f32
    %180 = vector.broadcast %cst_28 : f32 to vector<8x2xf32>
    %181 = arith.subf %179, %180 : vector<8x2xf32>
    %182 = arith.mulf %175, %157 : vector<8x2xf32>
    %183 = arith.mulf %174, %181 : vector<8x2xf32>
    %184 = arith.addf %182, %183 : vector<8x2xf32>
    %185 = math.tanh %184 : vector<8x2xf32>
    %186 = arith.mulf %176, %185 : vector<8x2xf32>
    %187 = vector.extract_strided_slice %49 {offsets = [40, 0], sizes = [8, 8], strides = [1, 1]} : vector<64x8xf32> to vector<8x8xf32>
    %188 = vector.extract_strided_slice %186 {offsets = [0, 0], sizes = [8, 1], strides = [1, 1]} : vector<8x2xf32> to vector<8x1xf32>
    %189 = vector.broadcast %188 : vector<8x1xf32> to vector<8x8xf32>
    %190 = arith.mulf %189, %2 : vector<8x8xf32>
    %191 = arith.addf %187, %190 : vector<8x8xf32>
    %192 = vector.extract_strided_slice %186 {offsets = [0, 1], sizes = [8, 1], strides = [1, 1]} : vector<8x2xf32> to vector<8x1xf32>
    %193 = vector.broadcast %192 : vector<8x1xf32> to vector<8x8xf32>
    %194 = arith.mulf %193, %5 : vector<8x8xf32>
    %195 = arith.addf %191, %194 : vector<8x8xf32>
    %196 = arith.negf %195 : vector<8x8xf32>
    %197 = math.exp %196 : vector<8x8xf32>
    %cst_29 = arith.constant 1.000000e+00 : f32
    %198 = vector.broadcast %cst_29 : f32 to vector<8x8xf32>
    %199 = arith.addf %198, %197 : vector<8x8xf32>
    %200 = arith.divf %198, %199 : vector<8x8xf32>
    %201 = vector.extract_strided_slice %200 {offsets = [0, 0], sizes = [8, 2], strides = [1, 1]} : vector<8x8xf32> to vector<8x2xf32>
    %202 = vector.extract_strided_slice %200 {offsets = [0, 2], sizes = [8, 2], strides = [1, 1]} : vector<8x8xf32> to vector<8x2xf32>
    %203 = vector.extract_strided_slice %200 {offsets = [0, 4], sizes = [8, 2], strides = [1, 1]} : vector<8x8xf32> to vector<8x2xf32>
    %204 = vector.extract_strided_slice %200 {offsets = [0, 6], sizes = [8, 2], strides = [1, 1]} : vector<8x8xf32> to vector<8x2xf32>
    %cst_30 = arith.constant 2.000000e+00 : f32
    %205 = vector.broadcast %cst_30 : f32 to vector<8x2xf32>
    %206 = arith.mulf %205, %204 : vector<8x2xf32>
    %cst_31 = arith.constant 1.000000e+00 : f32
    %207 = vector.broadcast %cst_31 : f32 to vector<8x2xf32>
    %208 = arith.subf %206, %207 : vector<8x2xf32>
    %209 = arith.mulf %202, %184 : vector<8x2xf32>
    %210 = arith.mulf %201, %208 : vector<8x2xf32>
    %211 = arith.addf %209, %210 : vector<8x2xf32>
    %212 = math.tanh %211 : vector<8x2xf32>
    %213 = arith.mulf %203, %212 : vector<8x2xf32>
    %214 = vector.extract_strided_slice %49 {offsets = [48, 0], sizes = [8, 8], strides = [1, 1]} : vector<64x8xf32> to vector<8x8xf32>
    %215 = vector.extract_strided_slice %213 {offsets = [0, 0], sizes = [8, 1], strides = [1, 1]} : vector<8x2xf32> to vector<8x1xf32>
    %216 = vector.broadcast %215 : vector<8x1xf32> to vector<8x8xf32>
    %217 = arith.mulf %216, %2 : vector<8x8xf32>
    %218 = arith.addf %214, %217 : vector<8x8xf32>
    %219 = vector.extract_strided_slice %213 {offsets = [0, 1], sizes = [8, 1], strides = [1, 1]} : vector<8x2xf32> to vector<8x1xf32>
    %220 = vector.broadcast %219 : vector<8x1xf32> to vector<8x8xf32>
    %221 = arith.mulf %220, %5 : vector<8x8xf32>
    %222 = arith.addf %218, %221 : vector<8x8xf32>
    %223 = arith.negf %222 : vector<8x8xf32>
    %224 = math.exp %223 : vector<8x8xf32>
    %cst_32 = arith.constant 1.000000e+00 : f32
    %225 = vector.broadcast %cst_32 : f32 to vector<8x8xf32>
    %226 = arith.addf %225, %224 : vector<8x8xf32>
    %227 = arith.divf %225, %226 : vector<8x8xf32>
    %228 = vector.extract_strided_slice %227 {offsets = [0, 0], sizes = [8, 2], strides = [1, 1]} : vector<8x8xf32> to vector<8x2xf32>
    %229 = vector.extract_strided_slice %227 {offsets = [0, 2], sizes = [8, 2], strides = [1, 1]} : vector<8x8xf32> to vector<8x2xf32>
    %230 = vector.extract_strided_slice %227 {offsets = [0, 4], sizes = [8, 2], strides = [1, 1]} : vector<8x8xf32> to vector<8x2xf32>
    %231 = vector.extract_strided_slice %227 {offsets = [0, 6], sizes = [8, 2], strides = [1, 1]} : vector<8x8xf32> to vector<8x2xf32>
    %cst_33 = arith.constant 2.000000e+00 : f32
    %232 = vector.broadcast %cst_33 : f32 to vector<8x2xf32>
    %233 = arith.mulf %232, %231 : vector<8x2xf32>
    %cst_34 = arith.constant 1.000000e+00 : f32
    %234 = vector.broadcast %cst_34 : f32 to vector<8x2xf32>
    %235 = arith.subf %233, %234 : vector<8x2xf32>
    %236 = arith.mulf %229, %211 : vector<8x2xf32>
    %237 = arith.mulf %228, %235 : vector<8x2xf32>
    %238 = arith.addf %236, %237 : vector<8x2xf32>
    %239 = math.tanh %238 : vector<8x2xf32>
    %240 = arith.mulf %230, %239 : vector<8x2xf32>
    %241 = vector.extract_strided_slice %49 {offsets = [56, 0], sizes = [8, 8], strides = [1, 1]} : vector<64x8xf32> to vector<8x8xf32>
    %242 = vector.extract_strided_slice %240 {offsets = [0, 0], sizes = [8, 1], strides = [1, 1]} : vector<8x2xf32> to vector<8x1xf32>
    %243 = vector.broadcast %242 : vector<8x1xf32> to vector<8x8xf32>
    %244 = arith.mulf %243, %2 : vector<8x8xf32>
    %245 = arith.addf %241, %244 : vector<8x8xf32>
    %246 = vector.extract_strided_slice %240 {offsets = [0, 1], sizes = [8, 1], strides = [1, 1]} : vector<8x2xf32> to vector<8x1xf32>
    %247 = vector.broadcast %246 : vector<8x1xf32> to vector<8x8xf32>
    %248 = arith.mulf %247, %5 : vector<8x8xf32>
    %249 = arith.addf %245, %248 : vector<8x8xf32>
    %250 = arith.negf %249 : vector<8x8xf32>
    %251 = math.exp %250 : vector<8x8xf32>
    %cst_35 = arith.constant 1.000000e+00 : f32
    %252 = vector.broadcast %cst_35 : f32 to vector<8x8xf32>
    %253 = arith.addf %252, %251 : vector<8x8xf32>
    %254 = arith.divf %252, %253 : vector<8x8xf32>
    %255 = vector.extract_strided_slice %254 {offsets = [0, 0], sizes = [8, 2], strides = [1, 1]} : vector<8x8xf32> to vector<8x2xf32>
    %256 = vector.extract_strided_slice %254 {offsets = [0, 2], sizes = [8, 2], strides = [1, 1]} : vector<8x8xf32> to vector<8x2xf32>
    %257 = vector.extract_strided_slice %254 {offsets = [0, 4], sizes = [8, 2], strides = [1, 1]} : vector<8x8xf32> to vector<8x2xf32>
    %258 = vector.extract_strided_slice %254 {offsets = [0, 6], sizes = [8, 2], strides = [1, 1]} : vector<8x8xf32> to vector<8x2xf32>
    %cst_36 = arith.constant 2.000000e+00 : f32
    %259 = vector.broadcast %cst_36 : f32 to vector<8x2xf32>
    %260 = arith.mulf %259, %258 : vector<8x2xf32>
    %cst_37 = arith.constant 1.000000e+00 : f32
    %261 = vector.broadcast %cst_37 : f32 to vector<8x2xf32>
    %262 = arith.subf %260, %261 : vector<8x2xf32>
    %263 = arith.mulf %256, %238 : vector<8x2xf32>
    %264 = arith.mulf %255, %262 : vector<8x2xf32>
    %265 = arith.addf %263, %264 : vector<8x2xf32>
    %266 = math.tanh %265 : vector<8x2xf32>
    %267 = arith.mulf %257, %266 : vector<8x2xf32>
    %cst_38 = arith.constant 0.000000e+00 : f32
    %268 = vector.broadcast %cst_38 : f32 to vector<8x2xf32>
    %269 = arith.maximumf %267, %268 : vector<8x2xf32>
    %270 = vector.extract_strided_slice %269 {offsets = [0, 0], sizes = [8, 1], strides = [1, 1]} : vector<8x2xf32> to vector<8x1xf32>
    %271 = vector.broadcast %270 : vector<8x1xf32> to vector<8x128xf32>
    %272 = arith.mulf %271, %8 : vector<8x128xf32>
    %273 = arith.addf %14, %272 : vector<8x128xf32>
    %274 = vector.extract_strided_slice %269 {offsets = [0, 1], sizes = [8, 1], strides = [1, 1]} : vector<8x2xf32> to vector<8x1xf32>
    %275 = vector.broadcast %274 : vector<8x1xf32> to vector<8x128xf32>
    %276 = arith.mulf %275, %11 : vector<8x128xf32>
    %277 = arith.addf %273, %276 : vector<8x128xf32>
    %cst_39 = arith.constant 0.000000e+00 : f32
    %278 = vector.broadcast %cst_39 : f32 to vector<8x128xf32>
    %279 = arith.maximumf %277, %278 : vector<8x128xf32>
    %c40 = arith.constant 40 : index
    %c0_40 = arith.constant 0 : index
    %280 = vector.load %arg1[%c40, %c0_40] : memref<176x128xf32, #tpu.memory_space<vmem>>, vector<128x128xf32>
    %cst_41 = arith.constant dense<0.000000e+00> : vector<8x128xf32>
    %281 = tpu.matmul %279, %280, %cst_41 {dimension_numbers = #tpu.dot_dimension_numbers<[1], [0], [0], [1], [0, 0, 1, 1], [], []>} : vector<8x128xf32>, vector<128x128xf32>, vector<8x128xf32> -> vector<8x128xf32>
    %282 = arith.addf %281, %17 : vector<8x128xf32>
    %c0_42 = arith.constant 0 : index
    %c0_43 = arith.constant 0 : index
    %283 = vector.load %arg2[%c0_42, %c0_43] : memref<8x128xf32, #tpu.memory_space<vmem>>, vector<8x128xf32>
    tpu.vector_store %arg2[%c0_42, %c0_43], %282 {strides = array<i32>} : memref<8x128xf32, #tpu.memory_space<vmem>>, vector<8x128xf32>,
    return
  }
}

</mosaic_0001>

<bundles_post_ra>
// kernel: lstm_forward.1
= control target key start
LH: loop header
LB: loop body
LE: loop exit
PB: predicated region body
PF: predicated region fallthrough
CT: control target
= control target key end

     0   :  { %7 = vsyncpa [#allocation3], 0  ;;  %s873_s12 = smov [#allocation2]   ;;  %s874_s14 = smov 128   ;;  %s1075_s0 = inlined_call_operand.vmem [shape: f32[64,4], index: 0, kind: input, shape index: {}]   ;;  %s1076_s1 = inlined_call_operand.hbm [shape: f32[176,128], index: 1, kind: input, shape index: {}]   ;;  %s1077_s2 = inlined_call_operand.vmem [shape: f32[8,128], index: 2, kind: output, shape index: {}]  }
   0x1   :  { %s14_s11 = sshll.u32 %s1076_s1, 4  ;;  %s16_s13 = sshll.u32 %s873_s12, 4  ;;  %s15_s11 = int_to_ptr.hbm [resolvable:$true] %s14_s11  ;;  %s17_s13 = int_to_ptr.vmem [resolvable:$true] %s16_s13 }
   0x2   :  { %s875_s15 = smov 8  }
   0x3   :  { %22 = dma.hbm_to_vmem [thread:$0]  %s15_s11, 2816, %s17_s13, [#allocation3], %s874_s14, %s874_s14, %s875_s15  }
   0x4   :  { %871 = dma.done.wait [#allocation3], 2816  }
   0x5   :  { %872 = vsyncadd [#allocation3], 4294964480  ;;  %v876_v0 = vmov 0   ;;  %v877_v1 = vmov 2   ;;  %v39_v2 = vld [vmem:[%s1075_s0] sm:$0xff]  ;;  %v878_v3 = vmov 1  }
   0x6   :  { %740 = vset.pattern.permute.xlu0 %v876_v0  ;;  %742 = vset.pattern.permute.xlu1 %v877_v1  ;;  %v879_v4 = vmov 3   ;;  %v40_v5 = vld [vmem:[%s1075_s0 + $0x8] sm:$0xff]  ;;  %v914_v8 = vld [vmem:[#allocation2] ss:$0 sm:$0xff]  ;;  %v916_v9 = vld [vmem:[#allocation2 + $0x10] ss:$0 sm:$0xff] }
   0x7   :  { %744 = vset.pattern.permute.xlu2 %v876_v0  ;;  %53 = vperm.xlu0 %740, %v39_v2   ;;  %v919_v11 = vld [vmem:[#allocation2 + $0x1] ss:$0 sm:$0xff]  ;;  %v921_v12 = vld [vmem:[#allocation2 + $0x2] ss:$0 sm:$0xff]  ;;  %v923_v13 = vld [vmem:[#allocation2 + $0x3] ss:$0 sm:$0xff] }
   0x8   :  { %160 = vperm.xlu1 %742, %v39_v2   ;;  %v927_v18 = vld [vmem:[#allocation2 + $0x8] ss:$0 sm:$0xff]  ;;  %v930_v21 = vld [vmem:[#allocation2 + $0x9] ss:$0 sm:$0xff]  ;;  %s880_s19 = smov 122   ;;  %s881_s20 = smov 2  }
   0x9   :  { %v257_v24 = vmul.f32 0.0, %v927_v18  ;;  %v259_v26 = vmul.f32 0.0, %v930_v21  ;;  %v882_v50 = vmov 4   ;;  %v883_v51 = vmov 5  }
   0xf   :  { %741 = vset.pattern.permute.xlu0 %v878_v3 }
  0x10   :  { %743 = vset.pattern.permute.xlu1 %v879_v4  ;;  %110 = vperm.xlu0 %741, %v39_v2  }
  0x11   :  { %210 = vperm.xlu1 %743, %v39_v2  }
  0x18   :  { %114 = vperm.xlu0 %741, %v40_v5  }
  0x19   :  { %745 = vset.pattern.permute.xlu1 %v877_v1 }
  0x20   :  { %747 = vset.pattern.permute.xlu0 %v882_v50 }
  0x79   :  { %v54_v6 = vpop.permute.xlu0 %53 }
  0x7a   :  { %v161_v7 = vpop.permute.xlu1 %160  ;;  %v91_v10 = vmul.f32 %v914_v8, %v54_v6 }
  0x7b   :  { %v191_v19 = vmul.f32 %v921_v12, %v161_v7 }
  0x7c   :  { %v99_v16 = vadd.f32 %v916_v9, %v91_v10 }
  0x82   :  { %v111_v14 = vpop.permute.xlu0 %110 }
  0x83   :  { %v211_v15 = vpop.permute.xlu1 %210  ;;  %v141_v17 = vmul.f32 %v919_v11, %v111_v14 }
  0x84   :  { %v241_v22 = vmul.f32 %v923_v13, %v211_v15 }
  0x85   :  { %v149_v20 = vadd.f32 %v141_v17, %v99_v16 }
  0x87   :  { %v199_v23 = vadd.f32 %v191_v19, %v149_v20 }
  0x89   :  { %v249_v25 = vadd.f32 %v241_v22, %v199_v23 }
  0x8a   :  { %v115_v56 = vpop.permute.xlu0 %114 }
  0x8b   :  { %v258_v27 = vadd.f32 %v257_v24, %v249_v25  ;;  %v142_v59 = vmul.f32 %v919_v11, %v115_v56 }
  0x8d   :  { %v260_v28 = vadd.f32 %v259_v26, %v258_v27 }
  0x8f   :  { %v713_v29 = vmul.f32 -1.442695, %v260_v28 }
  0x91   :  { %799 = vpow2.f32 %v713_v29 }
  0x97   :  { %v800_v30 = vpop.eup %799 }
  0x98   :  { %v264_v31 = vadd.f32 1.0, %v800_v30 }
  0x9a   :  { %801 = vrcp.f32 %v264_v31  ;;  %v276_v35 = vand.u32 2147483648, %v264_v31  ;;  %v274_v37 = vand.u32 2147483647, %v264_v31  ;;  %vm270_vm1 = vweird.f32 %v264_v31 }
  0x9c   :  { %v277_v39 = vor.u32 1.1754944e-38, %v276_v35  ;;  %vm275_vm3 = vcmp.eq.f32.partialorder %v274_v37, 8.507059e+37 }
  0xa0   :  { %v802_v32 = vpop.eup %801 }
  0xa1   :  { %v266_v33 = vmul.f32 %v802_v32, %v264_v31  ;;  %vm271_vm0 = vweird.f32 %v802_v32 }
  0xa2   :  { %vm272_vm2 = vmor %vm270_vm1, %vm271_vm0 }
  0xa3   :  { %v267_v34 = vsub.f32 1.0, %v266_v33 }
  0xa5   :  { %v268_v36 = vmul.f32 %v802_v32, %v267_v34 }
  0xa7   :  { %v269_v38 = vadd.f32 %v802_v32, %v268_v36  ;;  %v41_v36 = vld [vmem:[%s1075_s0 + $0x10] sm:$0xff] }
  0xa9   :  { %v273_v40 = vsel %vm272_vm2, %v802_v32, %v269_v38 }
  0xaa   :  { %v278_v41 = vsel %vm275_vm3, %v277_v39, %v273_v40 }
  0xab   :  { %v280_v42 = vmul.f32 2.0, %v278_v41  ;;  %v282_v46 = vmul.f32 0.0, %v278_v41 }
  0xad   :  { %v714_v43 = vadd.f32 -1.0, %v280_v42 }
  0xaf   :  { %284 = vrot.lane.b32.xlu2 %v714_v43, %s880_s19 }
 0x109   :  { %v285_v44 = vpop.permute.xlu2 %284 }
 0x10a   :  { %v287_v45 = vmul.f32 %v285_v44, %v278_v41 }
 0x10c   :  { %289 = vrot.lane.b32.xlu2 %v287_v45, %s881_s20 }
 0x114   :  { %58 = vperm.xlu2 %744, %v40_v5  }
 0x11c   :  { %746 = vset.pattern.permute.xlu2 %v879_v4 }
 0x11d   :  { %214 = vperm.xlu2 %746, %v40_v5  }
 0x125   :  { %751 = vset.pattern.permute.xlu2 %v877_v1 }
 0x166   :  { %v290_v47 = vpop.permute.xlu2 %289 }
 0x167   :  { %v939_v48 = vadd.f32 %v290_v47, %v282_v46 }
 0x169   :  { %803 = vtanh.f32 %v939_v48 }
 0x16e   :  { %v59_v54 = vpop.permute.xlu2 %58 }
 0x16f   :  { %v804_v49 = vpop.eup %803  ;;  %v92_v55 = vmul.f32 %v914_v8, %v59_v54 }
 0x170   :  { %295 = vrot.lane.b32.xlu1 %v804_v49, %s881_s20 }
 0x171   :  { %v100_v58 = vadd.f32 %v916_v9, %v92_v55 }
 0x173   :  { %v150_v62 = vadd.f32 %v142_v59, %v100_v58 }
 0x177   :  { %v215_v61 = vpop.permute.xlu2 %214 }
 0x178   :  { %164 = vperm.xlu1 %745, %v40_v5   ;;  %v242_v2 = vmul.f32 %v923_v13, %v215_v61 }
 0x180   :  { %748 = vset.pattern.permute.xlu1 %v883_v51 }
 0x1e2   :  { %v296_v52 = vpop.permute.xlu1 %295 }
 0x1e3   :  { %v298_v53 = vmul.f32 %v296_v52, %v278_v41 }
 0x1e5   :  { %307 = vperm.xlu1 %748, %v298_v53   ;;  %301 = vperm.xlu0 %747, %v298_v53  }
 0x1ea   :  { %v165_v57 = vpop.permute.xlu1 %164 }
 0x1eb   :  { %v192_v60 = vmul.f32 %v921_v12, %v165_v57 }
 0x1ed   :  { %750 = vset.pattern.permute.xlu1 %v878_v3  ;;  %749 = vset.pattern.permute.xlu0 %v876_v0  ;;  %v200_v63 = vadd.f32 %v192_v60, %v150_v62 }
 0x1ee   :  { %63 = vperm.xlu0 %749, %v41_v36  }
 0x1ef   :  { %v250_v7 = vadd.f32 %v242_v2, %v200_v63 }
 0x1f6   :  { %754 = vset.pattern.permute.xlu0 %v883_v51 }
 0x257   :  { %v302_v5 = vpop.permute.xlu0 %301  ;;  %v308_v6 = vpop.permute.xlu1 %307 }
 0x258   :  { %v304_v10 = vmul.f32 %v927_v18, %v302_v5  ;;  %v310_v15 = vmul.f32 %v930_v21, %v308_v6 }
 0x25a   :  { %v305_v14 = vadd.f32 %v304_v10, %v250_v7 }
 0x25c   :  { %v311_v16 = vadd.f32 %v310_v15, %v305_v14 }
 0x25e   :  { %v715_v17 = vmul.f32 -1.442695, %v311_v16 }
 0x260   :  { %805 = vpow2.f32 %v715_v17  ;;  %v64_v43 = vpop.permute.xlu0 %63 }
 0x261   :  { %v93_v45 = vmul.f32 %v914_v8, %v64_v43 }
 0x266   :  { %v806_v19 = vpop.eup %805 }
 0x267   :  { %v315_v20 = vadd.f32 1.0, %v806_v19 }
 0x269   :  { %807 = vrcp.f32 %v315_v20  ;;  %v327_v25 = vand.u32 2147483648, %v315_v20  ;;  %v325_v27 = vand.u32 2147483647, %v315_v20  ;;  %vm321_vm5 = vweird.f32 %v315_v20 }
 0x26b   :  { %v328_v29 = vor.u32 1.1754944e-38, %v327_v25  ;;  %vm326_vm7 = vcmp.eq.f32.partialorder %v325_v27, 8.507059e+37  ;;  %v42_v27 = vld [vmem:[%s1075_s0 + $0x18] sm:$0xff] }
 0x26f   :  { %v808_v22 = vpop.eup %807 }
 0x270   :  { %v317_v23 = vmul.f32 %v808_v22, %v315_v20  ;;  %vm322_vm4 = vweird.f32 %v808_v22 }
 0x271   :  { %vm323_vm6 = vmor %vm321_vm5, %vm322_vm4 }
 0x272   :  { %v318_v24 = vsub.f32 1.0, %v317_v23 }
 0x274   :  { %v319_v26 = vmul.f32 %v808_v22, %v318_v24 }
 0x276   :  { %v320_v28 = vadd.f32 %v808_v22, %v319_v26 }
 0x278   :  { %v324_v30 = vsel %vm323_vm6, %v808_v22, %v320_v28 }
 0x279   :  { %v329_v31 = vsel %vm326_vm7, %v328_v29, %v324_v30 }
 0x27a   :  { %v331_v32 = vmul.f32 2.0, %v329_v31  ;;  %v333_v37 = vmul.f32 %v329_v31, %v939_v48  ;;  %v101_v48 = vadd.f32 %v916_v9, %v93_v45 }
 0x27c   :  { %v716_v33 = vadd.f32 -1.0, %v331_v32 }
 0x27e   :  { %335 = vrot.lane.b32.xlu2 %v716_v33, %s880_s19 }
 0x2d8   :  { %v336_v34 = vpop.permute.xlu2 %335 }
 0x2d9   :  { %v338_v35 = vmul.f32 %v336_v34, %v329_v31 }
 0x2db   :  { %340 = vrot.lane.b32.xlu1 %v338_v35, %s881_s20 }
 0x2e3   :  { %118 = vperm.xlu1 %750, %v41_v36  }
 0x2eb   :  { %752 = vset.pattern.permute.xlu1 %v879_v4 }
 0x2ec   :  { %218 = vperm.xlu1 %752, %v41_v36  }
 0x2f4   :  { %757 = vset.pattern.permute.xlu1 %v877_v1 }
 0x34d   :  { %v341_v38 = vpop.permute.xlu1 %340 }
 0x34e   :  { %v343_v39 = vadd.f32 %v341_v38, %v333_v37 }
 0x350   :  { %809 = vtanh.f32 %v343_v39 }
 0x355   :  { %v119_v44 = vpop.permute.xlu1 %118 }
 0x356   :  { %v810_v40 = vpop.eup %809  ;;  %v143_v47 = vmul.f32 %v919_v11, %v119_v44 }
 0x357   :  { %346 = vrot.lane.b32.xlu2 %v810_v40, %s881_s20 }
 0x358   :  { %v151_v49 = vadd.f32 %v143_v47, %v101_v48 }
 0x35e   :  { %v219_v53 = vpop.permute.xlu1 %218 }
 0x35f   :  { %168 = vperm.xlu2 %751, %v41_v36   ;;  %v243_v55 = vmul.f32 %v923_v13, %v219_v53 }
 0x367   :  { %753 = vset.pattern.permute.xlu2 %v882_v50 }
 0x3b1   :  { %v347_v41 = vpop.permute.xlu2 %346 }
 0x3b2   :  { %v349_v42 = vmul.f32 %v347_v41, %v329_v31 }
 0x3b4   :  { %358 = vperm.xlu0 %754, %v349_v42   ;;  %352 = vperm.xlu2 %753, %v349_v42  }
 0x3b9   :  { %v169_v46 = vpop.permute.xlu2 %168 }
 0x3ba   :  { %v193_v52 = vmul.f32 %v921_v12, %v169_v46 }
 0x3bc   :  { %755 = vset.pattern.permute.xlu2 %v876_v0  ;;  %756 = vset.pattern.permute.xlu0 %v878_v3  ;;  %v201_v54 = vadd.f32 %v193_v52, %v151_v49 }
 0x3bd   :  { %122 = vperm.xlu0 %756, %v42_v27  }
 0x3be   :  { %v251_v57 = vadd.f32 %v243_v55, %v201_v54 }
 0x3c5   :  { %761 = vset.pattern.permute.xlu0 %v876_v0 }
 0x40e   :  { %v353_v56 = vpop.permute.xlu2 %352 }
 0x40f   :  { %v355_v58 = vmul.f32 %v927_v18, %v353_v56 }
 0x411   :  { %v356_v60 = vadd.f32 %v355_v58, %v251_v57 }
 0x426   :  { %v359_v59 = vpop.permute.xlu0 %358 }
 0x427   :  { %v361_v61 = vmul.f32 %v930_v21, %v359_v59 }
 0x429   :  { %v362_v62 = vadd.f32 %v361_v61, %v356_v60 }
 0x42b   :  { %v717_v63 = vmul.f32 -1.442695, %v362_v62 }
 0x42d   :  { %811 = vpow2.f32 %v717_v63 }
 0x42f   :  { %v123_v36 = vpop.permute.xlu0 %122 }
 0x430   :  { %v144_v38 = vmul.f32 %v919_v11, %v123_v36 }
 0x433   :  { %v812_v2 = vpop.eup %811 }
 0x434   :  { %v366_v5 = vadd.f32 1.0, %v812_v2 }
 0x436   :  { %813 = vrcp.f32 %v366_v5  ;;  %v378_v14 = vand.u32 2147483648, %v366_v5  ;;  %v376_v16 = vand.u32 2147483647, %v366_v5  ;;  %vm372_vm9 = vweird.f32 %v366_v5 }
 0x438   :  { %v379_v19 = vor.u32 1.1754944e-38, %v378_v14  ;;  %vm377_vm11 = vcmp.eq.f32.partialorder %v376_v16, 8.507059e+37  ;;  %v43_v16 = vld [vmem:[%s1075_s0 + $0x20] sm:$0xff] }
 0x43c   :  { %v814_v6 = vpop.eup %813 }
 0x43d   :  { %v368_v7 = vmul.f32 %v814_v6, %v366_v5  ;;  %vm373_vm8 = vweird.f32 %v814_v6 }
 0x43e   :  { %vm374_vm10 = vmor %vm372_vm9, %vm373_vm8 }
 0x43f   :  { %v369_v10 = vsub.f32 1.0, %v368_v7 }
 0x441   :  { %v370_v15 = vmul.f32 %v814_v6, %v369_v10 }
 0x443   :  { %v371_v17 = vadd.f32 %v814_v6, %v370_v15 }
 0x445   :  { %v375_v20 = vsel %vm374_vm10, %v814_v6, %v371_v17 }
 0x446   :  { %v380_v22 = vsel %vm377_vm11, %v379_v19, %v375_v20 }
 0x447   :  { %v382_v23 = vmul.f32 2.0, %v380_v22  ;;  %v384_v28 = vmul.f32 %v380_v22, %v343_v39 }
 0x449   :  { %v718_v24 = vadd.f32 -1.0, %v382_v23 }
 0x44b   :  { %386 = vrot.lane.b32.xlu1 %v718_v24, %s880_s19 }
 0x4bd   :  { %v387_v25 = vpop.permute.xlu1 %386 }
 0x4be   :  { %v389_v26 = vmul.f32 %v387_v25, %v380_v22 }
 0x4c0   :  { %391 = vrot.lane.b32.xlu2 %v389_v26, %s881_s20 }
 0x4c8   :  { %68 = vperm.xlu2 %755, %v42_v27  }
 0x4d0   :  { %758 = vset.pattern.permute.xlu2 %v879_v4 }
 0x4d1   :  { %222 = vperm.xlu2 %758, %v42_v27  }
 0x4d9   :  { %760 = vset.pattern.permute.xlu2 %v883_v51 }
 0x51a   :  { %v392_v29 = vpop.permute.xlu2 %391 }
 0x51b   :  { %v394_v30 = vadd.f32 %v392_v29, %v384_v28 }
 0x51d   :  { %815 = vtanh.f32 %v394_v30 }
 0x522   :  { %v69_v34 = vpop.permute.xlu2 %68 }
 0x523   :  { %v816_v31 = vpop.eup %815  ;;  %v94_v35 = vmul.f32 %v914_v8, %v69_v34 }
 0x524   :  { %397 = vrot.lane.b32.xlu1 %v816_v31, %s881_s20 }
 0x525   :  { %v102_v37 = vadd.f32 %v916_v9, %v94_v35 }
 0x527   :  { %v152_v41 = vadd.f32 %v144_v38, %v102_v37 }
 0x52b   :  { %v223_v39 = vpop.permute.xlu2 %222 }
 0x52c   :  { %172 = vperm.xlu1 %757, %v42_v27   ;;  %v244_v43 = vmul.f32 %v923_v13, %v223_v39 }
 0x534   :  { %759 = vset.pattern.permute.xlu1 %v882_v50 }
 0x596   :  { %v398_v32 = vpop.permute.xlu1 %397 }
 0x597   :  { %v400_v33 = vmul.f32 %v398_v32, %v380_v22 }
 0x599   :  { %409 = vperm.xlu2 %760, %v400_v33   ;;  %403 = vperm.xlu1 %759, %v400_v33  }
 0x59e   :  { %v173_v40 = vpop.permute.xlu1 %172 }
 0x59f   :  { %v194_v42 = vmul.f32 %v921_v12, %v173_v40 }
 0x5a1   :  { %762 = vset.pattern.permute.xlu1 %v878_v3  ;;  %763 = vset.pattern.permute.xlu2 %v877_v1  ;;  %v202_v44 = vadd.f32 %v194_v42, %v152_v41 }
 0x5a3   :  { %v252_v47 = vadd.f32 %v244_v43, %v202_v44 }
 0x5f3   :  { %v410_v45 = vpop.permute.xlu2 %409 }
 0x5f4   :  { %v412_v49 = vmul.f32 %v930_v21, %v410_v45 }
 0x60b   :  { %v404_v46 = vpop.permute.xlu1 %403 }
 0x60c   :  { %v406_v48 = vmul.f32 %v927_v18, %v404_v46 }
 0x60e   :  { %v407_v52 = vadd.f32 %v406_v48, %v252_v47 }
 0x610   :  { %v413_v53 = vadd.f32 %v412_v49, %v407_v52 }
 0x612   :  { %v719_v54 = vmul.f32 -1.442695, %v413_v53 }
 0x614   :  { %817 = vpow2.f32 %v719_v54 }
 0x61a   :  { %v818_v55 = vpop.eup %817 }
 0x61b   :  { %v417_v56 = vadd.f32 1.0, %v818_v55 }
 0x61d   :  { %819 = vrcp.f32 %v417_v56  ;;  %v429_v60 = vand.u32 2147483648, %v417_v56  ;;  %v427_v62 = vand.u32 2147483647, %v417_v56  ;;  %vm423_vm13 = vweird.f32 %v417_v56 }
 0x61f   :  { %v430_v2 = vor.u32 1.1754944e-38, %v429_v60  ;;  %vm428_vm15 = vcmp.eq.f32.partialorder %v427_v62, 8.507059e+37  ;;  %v44_v62 = vld [vmem:[%s1075_s0 + $0x28] sm:$0xff] }
 0x623   :  { %v820_v57 = vpop.eup %819 }
 0x624   :  { %v419_v58 = vmul.f32 %v820_v57, %v417_v56  ;;  %vm424_vm12 = vweird.f32 %v820_v57 }
 0x625   :  { %vm425_vm14 = vmor %vm423_vm13, %vm424_vm12 }
 0x626   :  { %v420_v59 = vsub.f32 1.0, %v419_v58 }
 0x628   :  { %v421_v61 = vmul.f32 %v820_v57, %v420_v59 }
 0x62a   :  { %v422_v63 = vadd.f32 %v820_v57, %v421_v61 }
 0x62c   :  { %v426_v5 = vsel %vm425_vm14, %v820_v57, %v422_v63 }
 0x62d   :  { %v431_v6 = vsel %vm428_vm15, %v430_v2, %v426_v5 }
 0x62e   :  { %v433_v7 = vmul.f32 2.0, %v431_v6  ;;  %v435_v17 = vmul.f32 %v431_v6, %v394_v30 }
 0x630   :  { %v720_v10 = vadd.f32 -1.0, %v433_v7 }
 0x632   :  { %437 = vrot.lane.b32.xlu0 %v720_v10, %s880_s19 }
 0x63a   :  { %73 = vperm.xlu0 %761, %v43_v16  }
 0x642   :  { %766 = vset.pattern.permute.xlu0 %v883_v51 }
 0x6a4   :  { %v438_v14 = vpop.permute.xlu0 %437 }
 0x6a5   :  { %v440_v15 = vmul.f32 %v438_v14, %v431_v6 }
 0x6a7   :  { %442 = vrot.lane.b32.xlu1 %v440_v15, %s881_s20 }
 0x6ac   :  { %v74_v25 = vpop.permute.xlu0 %73 }
 0x6ad   :  { %v95_v27 = vmul.f32 %v914_v8, %v74_v25 }
 0x6af   :  { %126 = vperm.xlu1 %762, %v43_v16   ;;  %v103_v30 = vadd.f32 %v916_v9, %v95_v27 }
 0x6b7   :  { %764 = vset.pattern.permute.xlu1 %v879_v4 }
 0x6b8   :  { %226 = vperm.xlu1 %764, %v43_v16  }
 0x6c0   :  { %769 = vset.pattern.permute.xlu1 %v877_v1 }
 0x719   :  { %v443_v19 = vpop.permute.xlu1 %442 }
 0x71a   :  { %v445_v20 = vadd.f32 %v443_v19, %v435_v17 }
 0x71c   :  { %821 = vtanh.f32 %v445_v20 }
 0x721   :  { %v127_v26 = vpop.permute.xlu1 %126 }
 0x722   :  { %v822_v22 = vpop.eup %821  ;;  %v145_v29 = vmul.f32 %v919_v11, %v127_v26 }
 0x723   :  { %448 = vrot.lane.b32.xlu2 %v822_v22, %s881_s20 }
 0x724   :  { %v153_v32 = vadd.f32 %v145_v29, %v103_v30 }
 0x72a   :  { %v227_v33 = vpop.permute.xlu1 %226 }
 0x72b   :  { %176 = vperm.xlu2 %763, %v43_v16   ;;  %v245_v35 = vmul.f32 %v923_v13, %v227_v33 }
 0x733   :  { %765 = vset.pattern.permute.xlu2 %v882_v50 }
 0x77d   :  { %v449_v23 = vpop.permute.xlu2 %448 }
 0x77e   :  { %v451_v24 = vmul.f32 %v449_v23, %v431_v6 }
 0x780   :  { %460 = vperm.xlu0 %766, %v451_v24   ;;  %454 = vperm.xlu2 %765, %v451_v24  }
 0x785   :  { %v177_v28 = vpop.permute.xlu2 %176 }
 0x786   :  { %v195_v31 = vmul.f32 %v921_v12, %v177_v28 }
 0x788   :  { %767 = vset.pattern.permute.xlu2 %v876_v0  ;;  %768 = vset.pattern.permute.xlu0 %v878_v3  ;;  %v203_v34 = vadd.f32 %v195_v31, %v153_v32 }
 0x789   :  { %130 = vperm.xlu0 %768, %v44_v62  }
 0x78a   :  { %v253_v37 = vadd.f32 %v245_v35, %v203_v34 }
 0x791   :  { %773 = vset.pattern.permute.xlu0 %v876_v0 }
 0x7da   :  { %v455_v36 = vpop.permute.xlu2 %454 }
 0x7db   :  { %v457_v38 = vmul.f32 %v927_v18, %v455_v36 }
 0x7dd   :  { %v458_v40 = vadd.f32 %v457_v38, %v253_v37 }
 0x7f2   :  { %v461_v39 = vpop.permute.xlu0 %460 }
 0x7f3   :  { %v463_v41 = vmul.f32 %v930_v21, %v461_v39 }
 0x7f5   :  { %v464_v42 = vadd.f32 %v463_v41, %v458_v40 }
 0x7f7   :  { %v721_v43 = vmul.f32 -1.442695, %v464_v42 }
 0x7f9   :  { %823 = vpow2.f32 %v721_v43 }
 0x7fb   :  { %v131_v16 = vpop.permute.xlu0 %130 }
 0x7fc   :  { %v146_v19 = vmul.f32 %v919_v11, %v131_v16 }
 0x7ff   :  { %v824_v44 = vpop.eup %823 }
 0x800   :  { %v468_v45 = vadd.f32 1.0, %v824_v44 }
 0x802   :  { %825 = vrcp.f32 %v468_v45  ;;  %v480_v49 = vand.u32 2147483648, %v468_v45  ;;  %v478_v53 = vand.u32 2147483647, %v468_v45  ;;  %vm474_vm1 = vweird.f32 %v468_v45 }
 0x804   :  { %v481_v55 = vor.u32 1.1754944e-38, %v480_v49  ;;  %vm479_vm3 = vcmp.eq.f32.partialorder %v478_v53, 8.507059e+37  ;;  %v45_v53 = vld [vmem:[%s1075_s0 + $0x30] sm:$0xff] }
 0x808   :  { %v826_v46 = vpop.eup %825 }
 0x809   :  { %v470_v47 = vmul.f32 %v826_v46, %v468_v45  ;;  %vm475_vm0 = vweird.f32 %v826_v46 }
 0x80a   :  { %vm476_vm2 = vmor %vm474_vm1, %vm475_vm0 }
 0x80b   :  { %v471_v48 = vsub.f32 1.0, %v470_v47 }
 0x80d   :  { %v472_v52 = vmul.f32 %v826_v46, %v471_v48 }
 0x80f   :  { %v473_v54 = vadd.f32 %v826_v46, %v472_v52 }
 0x811   :  { %v477_v56 = vsel %vm476_vm2, %v826_v46, %v473_v54 }
 0x812   :  { %v482_v57 = vsel %vm479_vm3, %v481_v55, %v477_v56 }
 0x813   :  { %v484_v58 = vmul.f32 2.0, %v482_v57  ;;  %v486_v63 = vmul.f32 %v482_v57, %v445_v20 }
 0x815   :  { %v722_v59 = vadd.f32 -1.0, %v484_v58 }
 0x817   :  { %488 = vrot.lane.b32.xlu1 %v722_v59, %s880_s19 }
 0x889   :  { %v489_v60 = vpop.permute.xlu1 %488 }
 0x88a   :  { %v491_v61 = vmul.f32 %v489_v60, %v482_v57 }
 0x88c   :  { %493 = vrot.lane.b32.xlu2 %v491_v61, %s881_s20 }
 0x894   :  { %78 = vperm.xlu2 %767, %v44_v62  }
 0x89c   :  { %770 = vset.pattern.permute.xlu2 %v879_v4 }
 0x89d   :  { %230 = vperm.xlu2 %770, %v44_v62  }
 0x8a5   :  { %772 = vset.pattern.permute.xlu2 %v883_v51 }
 0x8e6   :  { %v494_v2 = vpop.permute.xlu2 %493 }
 0x8e7   :  { %v496_v5 = vadd.f32 %v494_v2, %v486_v63 }
 0x8e9   :  { %827 = vtanh.f32 %v496_v5 }
 0x8ee   :  { %v79_v14 = vpop.permute.xlu2 %78 }
 0x8ef   :  { %v828_v6 = vpop.eup %827  ;;  %v96_v15 = vmul.f32 %v914_v8, %v79_v14 }
 0x8f0   :  { %499 = vrot.lane.b32.xlu1 %v828_v6, %s881_s20 }
 0x8f1   :  { %v104_v17 = vadd.f32 %v916_v9, %v96_v15 }
 0x8f3   :  { %v154_v23 = vadd.f32 %v146_v19, %v104_v17 }
 0x8f7   :  { %v231_v20 = vpop.permute.xlu2 %230 }
 0x8f8   :  { %180 = vperm.xlu1 %769, %v44_v62   ;;  %v246_v25 = vmul.f32 %v923_v13, %v231_v20 }
 0x900   :  { %771 = vset.pattern.permute.xlu1 %v882_v50 }
 0x962   :  { %v500_v7 = vpop.permute.xlu1 %499 }
 0x963   :  { %v502_v10 = vmul.f32 %v500_v7, %v482_v57 }
 0x965   :  { %511 = vperm.xlu2 %772, %v502_v10   ;;  %505 = vperm.xlu1 %771, %v502_v10  }
 0x96a   :  { %v181_v22 = vpop.permute.xlu1 %180 }
 0x96b   :  { %v196_v24 = vmul.f32 %v921_v12, %v181_v22 }
 0x96d   :  { %774 = vset.pattern.permute.xlu1 %v878_v3  ;;  %775 = vset.pattern.permute.xlu2 %v877_v1  ;;  %v204_v26 = vadd.f32 %v196_v24, %v154_v23 }
 0x96f   :  { %v254_v29 = vadd.f32 %v246_v25, %v204_v26 }
 0x9bf   :  { %v512_v27 = vpop.permute.xlu2 %511 }
 0x9c0   :  { %v514_v31 = vmul.f32 %v930_v21, %v512_v27 }
 0x9d7   :  { %v506_v28 = vpop.permute.xlu1 %505 }
 0x9d8   :  { %v508_v30 = vmul.f32 %v927_v18, %v506_v28 }
 0x9da   :  { %v509_v32 = vadd.f32 %v508_v30, %v254_v29 }
 0x9dc   :  { %v515_v33 = vadd.f32 %v514_v31, %v509_v32 }
 0x9de   :  { %v723_v34 = vmul.f32 -1.442695, %v515_v33 }
 0x9e0   :  { %829 = vpow2.f32 %v723_v34 }
 0x9e6   :  { %v830_v35 = vpop.eup %829 }
 0x9e7   :  { %v519_v36 = vadd.f32 1.0, %v830_v35 }
 0x9e9   :  { %831 = vrcp.f32 %v519_v36  ;;  %v531_v40 = vand.u32 2147483648, %v519_v36  ;;  %v529_v42 = vand.u32 2147483647, %v519_v36  ;;  %vm525_vm5 = vweird.f32 %v519_v36 }
 0x9eb   :  { %v532_v44 = vor.u32 1.1754944e-38, %v531_v40  ;;  %vm530_vm7 = vcmp.eq.f32.partialorder %v529_v42, 8.507059e+37 }
 0x9ef   :  { %v832_v37 = vpop.eup %831 }
 0x9f0   :  { %v521_v38 = vmul.f32 %v832_v37, %v519_v36  ;;  %vm526_vm4 = vweird.f32 %v832_v37 }
 0x9f1   :  { %vm527_vm6 = vmor %vm525_vm5, %vm526_vm4 }
 0x9f2   :  { %v522_v39 = vsub.f32 1.0, %v521_v38 }
 0x9f4   :  { %v523_v41 = vmul.f32 %v832_v37, %v522_v39  ;;  %v46_v39 = vld [vmem:[%s1075_s0 + $0x38] sm:$0xff] }
 0x9f6   :  { %v524_v43 = vadd.f32 %v832_v37, %v523_v41 }
 0x9f8   :  { %v528_v45 = vsel %vm527_vm6, %v832_v37, %v524_v43 }
 0x9f9   :  { %v533_v46 = vsel %vm530_vm7, %v532_v44, %v528_v45 }
 0x9fa   :  { %v535_v47 = vmul.f32 2.0, %v533_v46  ;;  %v537_v54 = vmul.f32 %v533_v46, %v496_v5 }
 0x9fc   :  { %v724_v48 = vadd.f32 -1.0, %v535_v47 }
 0x9fe   :  { %539 = vrot.lane.b32.xlu0 %v724_v48, %s880_s19 }
 0xa06   :  { %83 = vperm.xlu0 %773, %v45_v53  }
 0xa0e   :  { %778 = vset.pattern.permute.xlu0 %v883_v51 }
 0xa70   :  { %v540_v49 = vpop.permute.xlu0 %539 }
 0xa71   :  { %v542_v52 = vmul.f32 %v540_v49, %v533_v46 }
 0xa73   :  { %544 = vrot.lane.b32.xlu1 %v542_v52, %s881_s20 }
 0xa78   :  { %v84_v60 = vpop.permute.xlu0 %83 }
 0xa79   :  { %v97_v61 = vmul.f32 %v914_v8, %v84_v60 }
 0xa7b   :  { %134 = vperm.xlu1 %774, %v45_v53   ;;  %v105_v2 = vadd.f32 %v916_v9, %v97_v61 }
 0xa83   :  { %776 = vset.pattern.permute.xlu1 %v879_v4 }
 0xa84   :  { %234 = vperm.xlu1 %776, %v45_v53  }
 0xa8c   :  { %781 = vset.pattern.permute.xlu1 %v877_v1 }
 0xae5   :  { %v545_v55 = vpop.permute.xlu1 %544 }
 0xae6   :  { %v547_v56 = vadd.f32 %v545_v55, %v537_v54 }
 0xae8   :  { %833 = vtanh.f32 %v547_v56 }
 0xaed   :  { %v135_v1 = vpop.permute.xlu1 %134 }
 0xaee   :  { %v834_v57 = vpop.eup %833  ;;  %v147_v63 = vmul.f32 %v919_v11, %v135_v1 }
 0xaef   :  { %550 = vrot.lane.b32.xlu2 %v834_v57, %s881_s20 }
 0xaf0   :  { %v155_v6 = vadd.f32 %v147_v63, %v105_v2 }
 0xaf6   :  { %v235_v7 = vpop.permute.xlu1 %234 }
 0xaf7   :  { %184 = vperm.xlu2 %775, %v45_v53   ;;  %v247_v14 = vmul.f32 %v923_v13, %v235_v7 }
 0xaff   :  { %777 = vset.pattern.permute.xlu2 %v882_v50 }
 0xb49   :  { %v551_v58 = vpop.permute.xlu2 %550 }
 0xb4a   :  { %v553_v59 = vmul.f32 %v551_v58, %v533_v46 }
 0xb4c   :  { %562 = vperm.xlu0 %778, %v553_v59   ;;  %556 = vperm.xlu2 %777, %v553_v59  }
 0xb51   :  { %v185_v62 = vpop.permute.xlu2 %184 }
 0xb52   :  { %v197_v5 = vmul.f32 %v921_v12, %v185_v62 }
 0xb54   :  { %779 = vset.pattern.permute.xlu2 %v876_v0  ;;  %780 = vset.pattern.permute.xlu0 %v878_v3  ;;  %v205_v10 = vadd.f32 %v197_v5, %v155_v6 }
 0xb55   :  { %138 = vperm.xlu0 %780, %v46_v39  }
 0xb56   :  { %v255_v0 = vadd.f32 %v247_v14, %v205_v10 }
 0xb5d   :  { %785 = vset.pattern.permute.xlu0 %v882_v50 }
 0xba6   :  { %v557_v15 = vpop.permute.xlu2 %556 }
 0xba7   :  { %v559_v3 = vmul.f32 %v927_v18, %v557_v15 }
 0xba9   :  { %v560_v17 = vadd.f32 %v559_v3, %v255_v0 }
 0xbbe   :  { %v563_v16 = vpop.permute.xlu0 %562 }
 0xbbf   :  { %v565_v19 = vmul.f32 %v930_v21, %v563_v16 }
 0xbc1   :  { %v566_v20 = vadd.f32 %v565_v19, %v560_v17 }
 0xbc3   :  { %v725_v22 = vmul.f32 -1.442695, %v566_v20 }
 0xbc5   :  { %835 = vpow2.f32 %v725_v22  ;;  %v686_v22 = vld [vmem:[#allocation2 + $0xa0] sm:$0xff] }
 0xbc6   :  { %687 = vmatpush.msra.mxu0 %v686_v22 }
 0xbc7   :  { %v139_v47 = vpop.permute.xlu0 %138 }
 0xbc8   :  { %v148_v49 = vmul.f32 %v919_v11, %v139_v47 }
 0xbcb   :  { %v836_v23 = vpop.eup %835 }
 0xbcc   :  { %v570_v24 = vadd.f32 1.0, %v836_v23  ;;  %v685_v23 = vld [vmem:[#allocation2 + $0x98] sm:$0xff] }
 0xbcd   :  { %688 = vmatpush.msra.mxu0 %v685_v23 }
 0xbce   :  { %837 = vrcp.f32 %v570_v24  ;;  %v582_v28 = vand.u32 2147483648, %v570_v24  ;;  %v580_v30 = vand.u32 2147483647, %v570_v24  ;;  %vm576_vm9 = vweird.f32 %v570_v24 }
 0xbd0   :  { %v583_v32 = vor.u32 1.1754944e-38, %v582_v28  ;;  %vm581_vm11 = vcmp.eq.f32.partialorder %v580_v30, 8.507059e+37  ;;  %v680_v28 = vld [vmem:[#allocation2 + $0x70] sm:$0xff]  ;;  %v678_v30 = vld [vmem:[#allocation2 + $0x60] sm:$0xff] }
 0xbd4   :  { %v838_v25 = vpop.eup %837 }
 0xbd5   :  { %v572_v26 = vmul.f32 %v838_v25, %v570_v24  ;;  %vm577_vm8 = vweird.f32 %v838_v25  ;;  %v684_v24 = vld [vmem:[#allocation2 + $0x90] sm:$0xff] }
 0xbd6   :  { %vm578_vm10 = vmor %vm576_vm9, %vm577_vm8  ;;  %689 = vmatpush.msra.mxu0 %v684_v24 }
 0xbd7   :  { %v573_v27 = vsub.f32 1.0, %v572_v26  ;;  %v682_v26 = vld [vmem:[#allocation2 + $0x80] sm:$0xff] }
 0xbd9   :  { %v574_v29 = vmul.f32 %v838_v25, %v573_v27  ;;  %v681_v27 = vld [vmem:[#allocation2 + $0x78] sm:$0xff] }
 0xbdb   :  { %v575_v31 = vadd.f32 %v838_v25, %v574_v29  ;;  %v679_v29 = vld [vmem:[#allocation2 + $0x68] sm:$0xff] }
 0xbdd   :  { %v579_v33 = vsel %vm578_vm10, %v838_v25, %v575_v31  ;;  %v683_v25 = vld [vmem:[#allocation2 + $0x88] sm:$0xff]  ;;  %v677_v31 = vld [vmem:[#allocation2 + $0x58] sm:$0xff] }
 0xbde   :  { %v584_v34 = vsel %vm581_vm11, %v583_v32, %v579_v33  ;;  %690 = vmatpush.msra.mxu0 %v683_v25  ;;  %v676_v32 = vld [vmem:[#allocation2 + $0x50] sm:$0xff]  ;;  %v675_v33 = vld [vmem:[#allocation2 + $0x48] sm:$0xff] }
 0xbdf   :  { %v586_v35 = vmul.f32 2.0, %v584_v34  ;;  %v588_v40 = vmul.f32 %v584_v34, %v547_v56 }
 0xbe0   :  { %691 = vmatpush.msra.mxu0 %v682_v26 }
 0xbe1   :  { %v726_v36 = vadd.f32 -1.0, %v586_v35 }
 0xbe2   :  { %692 = vmatpush.msra.mxu0 %v681_v27 }
 0xbe3   :  { %590 = vrot.lane.b32.xlu1 %v726_v36, %s880_s19 }
 0xbe4   :  { %693 = vmatpush.msra.mxu0 %v680_v28 }
 0xbe6   :  { %694 = vmatpush.msra.mxu0 %v679_v29 }
 0xbe8   :  { %695 = vmatpush.msra.mxu0 %v678_v30 }
 0xbea   :  { %696 = vmatpush.msra.mxu0 %v677_v31 }
 0xbec   :  { %697 = vmatpush.msra.mxu0 %v676_v32 }
 0xbee   :  { %698 = vmatpush.msra.mxu0 %v675_v33 }
 0xc55   :  { %v591_v37 = vpop.permute.xlu1 %590 }
 0xc56   :  { %v593_v38 = vmul.f32 %v591_v37, %v584_v34  ;;  %v674_v37 = vld [vmem:[#allocation2 + $0x40] sm:$0xff] }
 0xc57   :  { %699 = vmatpush.msra.mxu0 %v674_v37 }
 0xc58   :  { %595 = vrot.lane.b32.xlu2 %v593_v38, %s881_s20  ;;  %v673_v38 = vld [vmem:[#allocation2 + $0x38] sm:$0xff] }
 0xc59   :  { %700 = vmatpush.msra.mxu0 %v673_v38 }
 0xc60   :  { %88 = vperm.xlu2 %779, %v46_v39  }
 0xc68   :  { %782 = vset.pattern.permute.xlu2 %v879_v4 }
 0xc69   :  { %238 = vperm.xlu2 %782, %v46_v39  }
 0xc71   :  { %784 = vset.pattern.permute.xlu2 %v883_v51 }
 0xcb2   :  { %v596_v41 = vpop.permute.xlu2 %595 }
 0xcb3   :  { %v598_v42 = vadd.f32 %v596_v41, %v588_v40  ;;  %v671_v40 = vld [vmem:[#allocation2 + $0x28] sm:$0xff]  ;;  %v796_v41 = vld [vmem:[#allocation2 + $0x18] ss:$0 sm:$0xff] }
 0xcb5   :  { %839 = vtanh.f32 %v598_v42 }
 0xcba   :  { %v89_v4 = vpop.permute.xlu2 %88 }
 0xcbb   :  { %v840_v43 = vpop.eup %839  ;;  %v98_v46 = vmul.f32 %v914_v8, %v89_v4 }
 0xcbc   :  { %601 = vrot.lane.b32.xlu1 %v840_v43, %s881_s20  ;;  %v797_v43 = vld [vmem:[#allocation2 + $0x20] ss:$0 sm:$0xff] }
 0xcbd   :  { %v106_v48 = vadd.f32 %v916_v9, %v98_v46 }
 0xcbf   :  { %v156_v54 = vadd.f32 %v148_v49, %v106_v48 }
 0xcc3   :  { %v239_v52 = vpop.permute.xlu2 %238 }
 0xcc4   :  { %188 = vperm.xlu1 %781, %v46_v39   ;;  %v672_v39 = vld [vmem:[#allocation2 + $0x30] sm:$0xff] }
 0xcc5   :  { %701 = vmatpush.msra.mxu0 %v672_v39 }
 0xcc7   :  { %702 = vmatpush.msra.mxu0 %v671_v40 }
 0xccc   :  { %783 = vset.pattern.permute.xlu1 %v882_v50  ;;  %v248_v50 = vmul.f32 %v923_v13, %v239_v52 }
 0xd2e   :  { %v602_v44 = vpop.permute.xlu1 %601 }
 0xd2f   :  { %v604_v45 = vmul.f32 %v602_v44, %v584_v34 }
 0xd31   :  { %613 = vperm.xlu2 %784, %v604_v45   ;;  %607 = vperm.xlu1 %783, %v604_v45  }
 0xd36   :  { %v189_v53 = vpop.permute.xlu1 %188 }
 0xd37   :  { %v198_v55 = vmul.f32 %v921_v12, %v189_v53 }
 0xd39   :  { %786 = vset.pattern.permute.xlu1 %v883_v51  ;;  %v206_v56 = vadd.f32 %v198_v55, %v156_v54 }
 0xd3b   :  { %v256_v59 = vadd.f32 %v248_v50, %v206_v56 }
 0xd8b   :  { %v614_v57 = vpop.permute.xlu2 %613 }
 0xd8c   :  { %v616_v8 = vmul.f32 %v930_v21, %v614_v57 }
 0xda3   :  { %v608_v58 = vpop.permute.xlu1 %607 }
 0xda4   :  { %v610_v60 = vmul.f32 %v927_v18, %v608_v58 }
 0xda6   :  { %v611_v1 = vadd.f32 %v610_v60, %v256_v59 }
 0xda8   :  { %v617_v61 = vadd.f32 %v616_v8, %v611_v1 }
 0xdaa   :  { %v727_v9 = vmul.f32 -1.442695, %v617_v61 }
 0xdac   :  { %841 = vpow2.f32 %v727_v9 }
 0xdb2   :  { %v842_v11 = vpop.eup %841 }
 0xdb3   :  { %v621_v62 = vadd.f32 1.0, %v842_v11 }
 0xdb5   :  { %843 = vrcp.f32 %v621_v62  ;;  %v633_v5 = vand.u32 2147483648, %v621_v62  ;;  %v631_v6 = vand.u32 2147483647, %v621_v62  ;;  %vm627_vm13 = vweird.f32 %v621_v62 }
 0xdb7   :  { %v634_v18 = vor.u32 1.1754944e-38, %v633_v5  ;;  %vm632_vm15 = vcmp.eq.f32.partialorder %v631_v6, 8.507059e+37 }
 0xdbb   :  { %v844_v63 = vpop.eup %843 }
 0xdbc   :  { %v623_v2 = vmul.f32 %v844_v63, %v621_v62  ;;  %vm628_vm12 = vweird.f32 %v844_v63 }
 0xdbd   :  { %vm629_vm14 = vmor %vm627_vm13, %vm628_vm12 }
 0xdbe   :  { %v624_v12 = vsub.f32 1.0, %v623_v2 }
 0xdc0   :  { %v625_v13 = vmul.f32 %v844_v63, %v624_v12 }
 0xdc2   :  { %v626_v7 = vadd.f32 %v844_v63, %v625_v13 }
 0xdc4   :  { %v630_v10 = vsel %vm629_vm14, %v844_v63, %v626_v7 }
 0xdc5   :  { %v635_v21 = vsel %vm632_vm15, %v634_v18, %v630_v10 }
 0xdc6   :  { %v637_v14 = vmul.f32 2.0, %v635_v21  ;;  %v639_v16 = vmul.f32 %v635_v21, %v598_v42  ;;  %v795_v42 = vld [vmem:[#allocation2 + $0x19] ss:$0 sm:$0xff] }
 0xdc8   :  { %v728_v15 = vadd.f32 -1.0, %v637_v14 }
 0xdca   :  { %641 = vrot.lane.b32.xlu0 %v728_v15, %s880_s19 }
 0xe3c   :  { %v642_v0 = vpop.permute.xlu0 %641 }
 0xe3d   :  { %v644_v3 = vmul.f32 %v642_v0, %v635_v21 }
 0xe3f   :  { %646 = vrot.lane.b32.xlu1 %v644_v3, %s881_s20 }
 0xeb1   :  { %v647_v17 = vpop.permute.xlu1 %646 }
 0xeb2   :  { %v649_v19 = vadd.f32 %v647_v17, %v639_v16 }
 0xeb4   :  { %845 = vtanh.f32 %v649_v19 }
 0xeba   :  { %v846_v20 = vpop.eup %845 }
 0xebb   :  { %652 = vrot.lane.b32.xlu2 %v846_v20, %s881_s20 }
 0xf15   :  { %v653_v34 = vpop.permute.xlu2 %652 }
 0xf16   :  { %v655_v35 = vmul.f32 %v653_v34, %v635_v21 }
 0xf18   :  { %v656_v36 = vmax.f32 %v655_v35, 0.0 }
 0xf1a   :  { %665 = vperm.xlu1 %786, %v656_v36   ;;  %659 = vperm.xlu0 %785, %v656_v36  }
 0xf22   :  { %787 = vset.pattern.permute.xlu0 %v883_v51  ;;  %v798_v51 = vld [vmem:[#allocation2 + $0xa8] ss:$0 sm:$0xff] }
 0xf8c   :  { %v666_v44 = vpop.permute.xlu1 %665  ;;  %v660_v45 = vpop.permute.xlu0 %659 }
 0xf8d   :  { %v662_v4 = vmul.f32 %v796_v41, %v660_v45  ;;  %v668_v46 = vmul.f32 %v795_v42, %v666_v44 }
 0xf8f   :  { %v663_v47 = vadd.f32 %v797_v43, %v662_v4 }
 0xf91   :  { %v669_v48 = vadd.f32 %v668_v46, %v663_v47 }
 0xf93   :  { %v670_v49 = vmax.f32 %v669_v48, 0.0 }
 0xf95   :  { %703 = vmatmul.f32.vlgmr.msra.gmra.mxu0 %v670_v49 }
0x1012   :  { %v704_v52 = vpop.f32.mrf.mxu0 }
0x1013   :  { %v705_v53 = vadd.f32 %v798_v51, %v704_v52 }
0x1015   :  { %707 = vst [vmem:[%s1077_s2] sm:$0xff] %v705_v53 }
0x1016   :  { %712 = vsyncpa [#allocation3], 1 }

</bundles_post_ra>
